<compile_context>
chip_gen: v5e
topology: v5e:2x2
jax: 0.10.0
libtpu: 0.0.40
codegen_flags: <defaults>
</compile_context>

<pallas_src>
import functools
import math

import numpy as np
import jax
import jax.numpy as jnp
from jax.experimental import pallas as pl
from jax.experimental.pallas import tpu as pltpu


# ---------------------------------------------------------------------------
# Kernel: one grid step = Bt folded batches: 1x1 conv + bias + ReLU (+ pool).
# ---------------------------------------------------------------------------
def _fbstream2_kernel(x_ref, w_ref, b_ref, *rest, pooled):
    if pooled:
        p_ref, o_ref = rest
    else:
        (o_ref,) = rest

    # Wide MXU matmul: bf16 (cout_pad, cin) @ bf16 (cin, Bt*H*W), f32 acc.
    y = jnp.dot(w_ref[...], x_ref[...], preferred_element_type=jnp.float32)
    y = jnp.maximum(y + b_ref[...], 0.0)          # bias + ReLU in f32 (VPU)

    if pooled:
        # AvgPool2d(k) for all Bt images at once: one f32 MXU matmul against
        # the precomputed block-diagonal averaging matrix (Bt*HW, Bt*HWo).
        o_ref[...] = jnp.dot(
            y, p_ref[...], preferred_element_type=jnp.float32
        ).astype(o_ref.dtype)
    else:
        o_ref[...] = y.astype(o_ref.dtype)        # last_block: no pooling


# ---------------------------------------------------------------------------
# Helpers.
# ---------------------------------------------------------------------------
def _choose_bt(B, cin, HW, HWo, pooled):
    """Batch-fold factor: lane-dense output, VMEM-safe, >=2 steps if possible."""
    # Smallest fold making the output lane width a multiple of 128 lanes.
    bt = 128 // math.gcd(HWo, 128)

    def vmem_bytes(btc):
        xb = 2 * btc * cin * HW * 2                       # bf16 x, 2 buffers
        ob = 2 * 16 * btc * HWo * 4                       # f32 out, 2 buffers
        pb = 2 * (btc * HW) * (btc * HWo) * 4 if pooled else 0
        return xb + ob + pb

    # Grow the fold to amortize per-step overhead, but keep >= 2 grid steps
    # when the batch allows (v7x: 2 TensorCores) and stay far inside the
    # 32 MiB scoped-VMEM default (the pool matrix grows ~Bt^2).
    while bt < 64 and B > 2 * bt and vmem_bytes(2 * bt) <= (8 << 20):
        bt *= 2
    return bt


def _block_diag_pool_matrix(H, W, k, bt):
    """Host-built (bt*H*W, bt*Ho*Wo) AvgPool2d(k) matrix (compile-time const)."""
    Ho, Wo = H // k, W // k
    hw = np.arange(H * W)
    out_idx = (hw // W // k) * Wo + (hw % W) // k
    p = (out_idx[:, None] == np.arange(Ho * Wo)[None, :]).astype(np.float32)
    p *= 1.0 / (k * k)
    return jnp.asarray(np.kron(np.eye(bt, dtype=np.float32), p))


# ---------------------------------------------------------------------------
# Wrapper: torch-style NCHW in, NCHW out.
# ---------------------------------------------------------------------------
def fb_stream2(x_nchw, w, b, *, avg_pool_size=None):
    """x_nchw: (B, 16, H, W); w: (10, 16); b: (10,).  Returns NCHW f32."""
    B, cin, H, W = x_nchw.shape
    cout = w.shape[0]
    HW = H * W
    pooled = avg_pool_size is not None

    if pooled:
        k = avg_pool_size
        assert H % k == 0 and W % k == 0, "AvgPool size must divide H and W"
        Ho, Wo = H // k, W // k
    else:
        Ho, Wo = H, W
    HWo = Ho * Wo

    bt = _choose_bt(B, cin, HW, HWo, pooled)
    n_steps = pl.cdiv(B, bt)
    B_pad = n_steps * bt
    cout_pad = -(-cout // 8) * 8                 # 10 -> 16: sublane aligned

    # bf16 on the DMA/MXU path; batch folded onto the lane axis:
    # (B, cin, H, W) -> (cin, B_pad*HW), each image's H*W pixels contiguous
    # along lanes.  (Layout plumbing; XLA fuses pad + cast + transpose.)
    x = x_nchw.astype(jnp.bfloat16)
    if B_pad != B:
        x = jnp.pad(x, ((0, B_pad - B), (0, 0), (0, 0), (0, 0)))
    x = jnp.transpose(x.reshape(B_pad, cin, HW), (1, 0, 2))
    x = x.reshape(cin, B_pad * HW)

    w_p = jnp.zeros((cout_pad, cin), jnp.bfloat16).at[:cout].set(
        w.astype(jnp.bfloat16))
    b_p = jnp.zeros((cout_pad, 1), jnp.float32).at[:cout, 0].set(
        b.astype(jnp.float32))

    inputs = [x, w_p, b_p]
    in_specs = [
        pl.BlockSpec((cin, bt * HW), lambda i: (0, i)),
        pl.BlockSpec((cout_pad, cin), lambda i: (0, 0)),
        pl.BlockSpec((cout_pad, 1), lambda i: (0, 0)),
    ]

    flops = 2 * cout_pad * cin * B_pad * HW
    bytes_accessed = (x.size * 2 + w_p.size * 2 + b_p.size * 4
                      + cout_pad * B_pad * HWo * 4)

    if pooled:
        pmat = _block_diag_pool_matrix(H, W, k, bt)
        inputs.append(pmat)
        in_specs.append(pl.BlockSpec((bt * HW, bt * HWo), lambda i: (0, 0)))
        flops += 2 * cout_pad * (bt * HW) * (bt * HWo) * n_steps
        bytes_accessed += pmat.size * 4

    out = pl.pallas_call(
        functools.partial(_fbstream2_kernel, pooled=pooled),
        out_shape=jax.ShapeDtypeStruct((cout_pad, B_pad * HWo), jnp.float32),
        grid_spec=pltpu.PrefetchScalarGridSpec(
            num_scalar_prefetch=0,
            grid=(n_steps,),
            in_specs=in_specs,
            out_specs=pl.BlockSpec((cout_pad, bt * HWo), lambda i: (0, i)),
        ),
        compiler_params=pltpu.CompilerParams(
            dimension_semantics=("parallel",)),   # shards steps on v7x 2-TC
        cost_estimate=pl.CostEstimate(
            flops=flops, transcendentals=0, bytes_accessed=bytes_accessed),
    )(*inputs)

    # (cout_pad, B_pad*HWo) -> (B, cout, Ho, Wo); drop channel/batch padding.
    out = out.reshape(cout_pad, B_pad, HWo)[:cout, :B]
    return jnp.transpose(out, (1, 0, 2)).reshape(B, cout, Ho, Wo)


# ---------------------------------------------------------------------------
# Pure-JAX reference (mirrors the PyTorch forward) for correctness checking.
# ---------------------------------------------------------------------------
def fb_stream2_ref(x, w, b, avg_pool_size=None):
    y = jnp.einsum("oc,bchw->bohw", w, x,
                   precision=jax.lax.Precision.HIGHEST) + b[None, :, None, None]
    y = jnp.maximum(y, 0.0)
    if avg_pool_size is not None:
        k = avg_pool_size
        B, C, H, W = y.shape
        y = y.reshape(B, C, H // k, k, W // k, k).mean(axis=(3, 5))
    return y


if __name__ == "__main__":
    key = jax.random.PRNGKey(0)
    kx, kw, kb = jax.random.split(key, 3)

    B, CIN, H, W = 2, 16, 16, 16                  # Conv2d(16, 10, 1) input
    COUT, POOL = 10, 4

    x = jax.random.normal(kx, (B, CIN, H, W), jnp.float32)
    w = jax.random.normal(kw, (COUT, CIN), jnp.float32) * 0.1
    b = jax.random.normal(kb, (COUT,), jnp.float32) * 0.1

    # last_block=False: conv -> ReLU -> AvgPool(4)
    fwd_pool = jax.jit(functools.partial(fb_stream2, avg_pool_size=POOL))
    # last_block=True : conv -> ReLU
    fwd_last = jax.jit(functools.partial(fb_stream2, avg_pool_size=None))

    out_pool = jax.block_until_ready(fwd_pool(x, w, b))
    out_last = jax.block_until_ready(fwd_last(x, w, b))

    # Reference consumes the same bf16-rounded x/w the kernel sees (f32 math).
    x_bf = x.astype(jnp.bfloat16).astype(jnp.float32)
    w_bf = w.astype(jnp.bfloat16).astype(jnp.float32)
    ref_pool = fb_stream2_ref(x_bf, w_bf, b, POOL)
    ref_last = fb_stream2_ref(x_bf, w_bf, b, None)

    assert out_pool.shape == (B, COUT, H // POOL, W // POOL)
    assert out_last.shape == (B, COUT, H, W)
    assert bool(jnp.all(jnp.isfinite(out_pool)))
    assert bool(jnp.all(jnp.isfinite(out_last)))
    assert jnp.allclose(out_pool, ref_pool, atol=1e-4, rtol=1e-4)
    assert jnp.allclose(out_last, ref_last, atol=1e-4, rtol=1e-4)
    print("KERNEL_OK")
</pallas_src>

<mosaic_0001>
module attributes {stable_mosaic.version = 11 : i64} {
  func.func @_fbstream2_kernel(%arg0: i32, %arg1: memref<16x2048xbf16, #tpu.memory_space<vmem>>, %arg2: memref<16x16xbf16, #tpu.memory_space<vmem>>, %arg3: memref<16x1xf32, #tpu.memory_space<vmem>>, %arg4: memref<2048x128xf32, #tpu.memory_space<vmem>>, %arg5: memref<16x128xf32, #tpu.memory_space<vmem>>) attributes {dimension_semantics = [#tpu.dimension_semantics<parallel>], iteration_bounds = array<i64: 1>, scalar_prefetch = 0 : i64, scratch_operands = 0 : i64, tpu.core_type = #tpu.core_type<tc>, window_params = [{transform_indices = @transform_0, window_bounds = array<i64: 16, 2048>}, {pipeline_mode = #tpu.pipeline_mode<synchronous>, transform_indices = @transform_1, window_bounds = array<i64: 16, 16>}, {pipeline_mode = #tpu.pipeline_mode<synchronous>, transform_indices = @transform_2, window_bounds = array<i64: 16, 1>}, {pipeline_mode = #tpu.pipeline_mode<synchronous>, transform_indices = @transform_3, window_bounds = array<i64: 2048, 128>}, {transform_indices = @transform_4, window_bounds = array<i64: 16, 128>}]} {
    %c0 = arith.constant 0 : index
    %c0_0 = arith.constant 0 : index
    %0 = vector.load %arg2[%c0, %c0_0] : memref<16x16xbf16, #tpu.memory_space<vmem>>, vector<16x16xbf16>
    %c0_1 = arith.constant 0 : index
    %c0_2 = arith.constant 0 : index
    %1 = vector.load %arg1[%c0_1, %c0_2] : memref<16x2048xbf16, #tpu.memory_space<vmem>>, vector<16x2048xbf16>
    %cst = arith.constant dense<0.000000e+00> : vector<16x2048xf32>
    %2 = tpu.matmul %0, %1, %cst {dimension_numbers = #tpu.dot_dimension_numbers<[1], [0], [0], [1], [0, 0, 1, 1], [], []>} : vector<16x16xbf16>, vector<16x2048xbf16>, vector<16x2048xf32> -> vector<16x2048xf32>
    %c0_3 = arith.constant 0 : index
    %c0_4 = arith.constant 0 : index
    %3 = vector.load %arg3[%c0_3, %c0_4] : memref<16x1xf32, #tpu.memory_space<vmem>>, vector<16x1xf32>
    %4 = vector.broadcast %3 : vector<16x1xf32> to vector<16x2048xf32>
    %5 = arith.addf %2, %4 : vector<16x2048xf32>
    %cst_5 = arith.constant 0.000000e+00 : f32
    %6 = vector.broadcast %cst_5 : f32 to vector<16x2048xf32>
    %7 = arith.maximumf %5, %6 : vector<16x2048xf32>
    %c0_6 = arith.constant 0 : index
    %c0_7 = arith.constant 0 : index
    %8 = vector.load %arg4[%c0_6, %c0_7] : memref<2048x128xf32, #tpu.memory_space<vmem>>, vector<2048x128xf32>
    %cst_8 = arith.constant dense<0.000000e+00> : vector<16x128xf32>
    %9 = tpu.matmul %7, %8, %cst_8 {dimension_numbers = #tpu.dot_dimension_numbers<[1], [0], [0], [1], [0, 0, 1, 1], [], []>} : vector<16x2048xf32>, vector<2048x128xf32>, vector<16x128xf32> -> vector<16x128xf32>
    %c0_9 = arith.constant 0 : index
    %c0_10 = arith.constant 0 : index
    %10 = vector.load %arg5[%c0_9, %c0_10] : memref<16x128xf32, #tpu.memory_space<vmem>>, vector<16x128xf32>
    tpu.vector_store %arg5[%c0_9, %c0_10], %9 {strides = array<i32>} : memref<16x128xf32, #tpu.memory_space<vmem>>, vector<16x128xf32>,
    return
  }
  func.func @transform_0(%arg0: i32) -> (i32, i32) {
    %c0_i32 = arith.constant 0 : i32
    %c0_i32_0 = arith.constant 0 : i32
    return %c0_i32, %arg0 : i32, i32
  }
  func.func @transform_1(%arg0: i32) -> (i32, i32) {
    %c0_i32 = arith.constant 0 : i32
    %c0_i32_0 = arith.constant 0 : i32
    %c0_i32_1 = arith.constant 0 : i32
    return %c0_i32, %c0_i32_0 : i32, i32
  }
  func.func @transform_2(%arg0: i32) -> (i32, i32) {
    %c0_i32 = arith.constant 0 : i32
    %c0_i32_0 = arith.constant 0 : i32
    %c0_i32_1 = arith.constant 0 : i32
    return %c0_i32, %c0_i32_0 : i32, i32
  }
  func.func @transform_3(%arg0: i32) -> (i32, i32) {
    %c0_i32 = arith.constant 0 : i32
    %c0_i32_0 = arith.constant 0 : i32
    %c0_i32_1 = arith.constant 0 : i32
    return %c0_i32, %c0_i32_0 : i32, i32
  }
  func.func @transform_4(%arg0: i32) -> (i32, i32) {
    %c0_i32 = arith.constant 0 : i32
    %c0_i32_0 = arith.constant 0 : i32
    return %c0_i32, %arg0 : i32, i32
  }
}

</mosaic_0001>

<bundles_post_ra>
// kernel: fb_stream2.1
= control target key start
LH: loop header
LB: loop body
LE: loop exit
PB: predicated region body
PF: predicated region fallthrough
CT: control target
= control target key end

     0   :  { %v1126_v3 = vmov 0   ;;  %vm133_vm0 = vcmask 130048   ;;  %s2101_s0 = inlined_call_operand.vmem [shape: bf16[16,2048], index: 0, kind: input, shape index: {}]   ;;  %s2102_s1 = inlined_call_operand.vmem [shape: bf16[16,16], index: 1, kind: input, shape index: {}]   ;;  %s2103_s2 = inlined_call_operand.vmem [shape: f32[16,1], index: 2, kind: input, shape index: {}]   ;;  %s2104_s3 = inlined_call_operand.vmem [shape: f32[2048,128], index: 3, kind: input, shape index: {}]   ;;  %s2105_s4 = inlined_call_operand.vmem [shape: f32[16,128], index: 4, kind: output, shape index: {}]  }
   0x1   :  { %v1029_v0 = vld [vmem:[%s2101_s0] sm:$0xf]  ;;  %v1108_v2 = vld [vmem:[%s2101_s0 + $0x4] sm:$0xf]  ;;  %1125 = vset.pattern.permute.xlu0 %v1126_v3  ;;  %v1037_v6 = vld [vmem:[%s2101_s0 + $0x8] sm:$0xf] }
   0x2   :  { %v1116_v1 = vld [vmem:[%s2101_s0 + $0x3c] sm:$0xf0]  ;;  %v1031_v5 = vld [vmem:[%s2101_s0 + $0x40] sm:$0xf0]  ;;  %v1117_v7 = vld [vmem:[%s2101_s0 + $0x44] sm:$0xf0] }
   0x3   :  { %v1030_v4 = vor.u32 %v1116_v1, %v1029_v0  ;;  %v1034_v8 = vor.u32 %v1108_v2, %v1031_v5  ;;  %v1038_v9 = vor.u32 %v1117_v7, %v1037_v6  ;;  %v1109_v10 = vld [vmem:[%s2101_s0 + $0xc] sm:$0xf]  ;;  %v1179_v12 = vld [vmem:[%s2102_s1] sm:$0xff]  ;;  %v1045_v15 = vld [vmem:[%s2101_s0 + $0x10] sm:$0xf] }
   0x4   :  { %v1039_v11 = vld [vmem:[%s2101_s0 + $0x48] sm:$0xf0]  ;;  %v36_v14 = vld [vmem:[%s2103_s2] sm:$0xff]  ;;  %v1118_v16 = vld [vmem:[%s2101_s0 + $0x4c] sm:$0xf0] }
   0x5   :  { %144 = vmatpush.bf16.msra.mxu0 %v1030_v4  ;;  %v1042_v13 = vor.u32 %v1109_v10, %v1039_v11  ;;  %158 = vmatpush.bf16.msra.mxu1 %v1034_v8  ;;  %v1046_v17 = vor.u32 %v1118_v16, %v1045_v15  ;;  %v1110_v18 = vld [vmem:[%s2101_s0 + $0x14] sm:$0xf]  ;;  %v1053_v20 = vld [vmem:[%s2101_s0 + $0x18] sm:$0xf]  ;;  %v1111_v23 = vld [vmem:[%s2101_s0 + $0x1c] sm:$0xf] }
   0x6   :  { %172 = vmatpush.bf16.msra.mxu2 %v1038_v9  ;;  %v1047_v19 = vld [vmem:[%s2101_s0 + $0x50] sm:$0xf0]  ;;  %40 = vperm.xlu0 %1125, %v36_v14   ;;  %v1119_v22 = vld [vmem:[%s2101_s0 + $0x54] sm:$0xf0]  ;;  %v1055_v24 = vld [vmem:[%s2101_s0 + $0x58] sm:$0xf0] }
   0x7   :  { %186 = vmatpush.bf16.msra.mxu3 %v1042_v13  ;;  %v1050_v21 = vor.u32 %v1110_v18, %v1047_v19  ;;  %v1054_v25 = vor.u32 %v1119_v22, %v1053_v20  ;;  %v1058_v26 = vor.u32 %v1111_v23, %v1055_v24  ;;  %v1061_v27 = vld [vmem:[%s2101_s0 + $0x20] sm:$0xf]  ;;  %v1112_v30 = vld [vmem:[%s2101_s0 + $0x24] sm:$0xf]  ;;  %v1069_v32 = vld [vmem:[%s2101_s0 + $0x28] sm:$0xf] }
   0x8   :  { %1091 = vmatmul.msk.bf16.vlgmr.msra.gmra.mxu0 %vm133_vm0, %v1179_v12  ;;  %v1120_v28 = vld [vmem:[%s2101_s0 + $0x5c] sm:$0xf0]  ;;  %1092 = vmatmul.msk.bf16.vlgmr.msra.gmra.mxu1 %vm133_vm0, %v1179_v12  ;;  %v1063_v31 = vld [vmem:[%s2101_s0 + $0x60] sm:$0xf0]  ;;  %v1121_v34 = vld [vmem:[%s2101_s0 + $0x64] sm:$0xf0] }
   0x9   :  { %1093 = vmatmul.msk.bf16.vlgmr.msra.gmra.mxu2 %vm133_vm0, %v1179_v12  ;;  %v1062_v29 = vor.u32 %v1120_v28, %v1061_v27  ;;  %200 = vmatpush.bf16.msrb.mxu0 %v1046_v17  ;;  %v1066_v33 = vor.u32 %v1112_v30, %v1063_v31  ;;  %v1113_v35 = vld [vmem:[%s2101_s0 + $0x2c] sm:$0xf]  ;;  %v1070_v37 = vor.u32 %v1121_v34, %v1069_v32  ;;  %v1077_v40 = vld [vmem:[%s2101_s0 + $0x30] sm:$0xf]  ;;  %v1114_v42 = vld [vmem:[%s2101_s0 + $0x34] sm:$0xf] }
   0xa   :  { %1094 = vmatmul.msk.bf16.vlgmr.msra.gmra.mxu3 %vm133_vm0, %v1179_v12  ;;  %v1071_v36 = vld [vmem:[%s2101_s0 + $0x68] sm:$0xf0]  ;;  %214 = vmatpush.bf16.msrb.mxu1 %v1050_v21  ;;  %v1122_v41 = vld [vmem:[%s2101_s0 + $0x6c] sm:$0xf0]  ;;  %v1079_v43 = vld [vmem:[%s2101_s0 + $0x70] sm:$0xf0] }
   0xb   :  { %228 = vmatpush.bf16.msrb.mxu2 %v1054_v25  ;;  %v1074_v38 = vor.u32 %v1113_v35, %v1071_v36  ;;  %242 = vmatpush.bf16.msrb.mxu3 %v1058_v26  ;;  %v37_v39 = vld [vmem:[%s2103_s2 + $0x8] sm:$0xff]  ;;  %v1085_v44 = vld [vmem:[%s2101_s0 + $0x38] sm:$0xf]  ;;  %v1115_v46 = vld [vmem:[%s2101_s0 + $0x3c] sm:$0xf]  ;;  %v1078_v48 = vor.u32 %v1122_v41, %v1077_v40  ;;  %v1082_v49 = vor.u32 %v1114_v42, %v1079_v43 }
   0xc   :  { %v1123_v45 = vld [vmem:[%s2101_s0 + $0x74] sm:$0xf0]  ;;  %v1087_v47 = vld [vmem:[%s2101_s0 + $0x78] sm:$0xf0]  ;;  %v407_v55 = vld [vmem:[%s2104_s3 + $0x70] sm:$0xff] }
   0xd   :  { %256 = vmatpush.bf16.msra.mxu0 %v1062_v29  ;;  %v1086_v50 = vor.u32 %v1123_v45, %v1085_v44  ;;  %v1090_v51 = vor.u32 %v1115_v46, %v1087_v47  ;;  %v408_v52 = vld [vmem:[%s2104_s3 + $0x78] sm:$0xff]  ;;  %v423_v57 = vld [vmem:[%s2104_s3 + $0xf0] sm:$0xff]  ;;  %v406_v59 = vld [vmem:[%s2104_s3 + $0x68] sm:$0xff] }
   0xe   :  { %270 = vmatpush.bf16.msra.mxu1 %v1066_v33  ;;  %45 = vperm.xlu0 %1125, %v37_v39   ;;  %v424_v53 = vld [vmem:[%s2104_s3 + $0xf8] sm:$0xff]  ;;  %v439_v58 = vld [vmem:[%s2104_s3 + $0x170] sm:$0xff]  ;;  %v422_v61 = vld [vmem:[%s2104_s3 + $0xe8] sm:$0xff] }
   0xf   :  { %284 = vmatpush.bf16.msra.mxu2 %v1070_v37  ;;  %298 = vmatpush.bf16.msra.mxu3 %v1074_v38  ;;  %v440_v54 = vld [vmem:[%s2104_s3 + $0x178] sm:$0xff]  ;;  %v455_v60 = vld [vmem:[%s2104_s3 + $0x1f0] sm:$0xff]  ;;  %v438_v62 = vld [vmem:[%s2104_s3 + $0x168] sm:$0xff] }
  0x10   :  { %v456_v56 = vld [vmem:[%s2104_s3 + $0x1f8] sm:$0xff]  ;;  %v405_v63 = vld [vmem:[%s2104_s3 + $0x60] sm:$0xff]  ;;  %v454_v0 = vld [vmem:[%s2104_s3 + $0x1e8] sm:$0xff] }
  0x11   :  { %v421_v1 = vld [vmem:[%s2104_s3 + $0xe0] sm:$0xff]  ;;  %v404_v3 = vld [vmem:[%s2104_s3 + $0x58] sm:$0xff]  ;;  %v403_v7 = vld [vmem:[%s2104_s3 + $0x50] sm:$0xff] }
  0x12   :  { %v437_v2 = vld [vmem:[%s2104_s3 + $0x160] sm:$0xff]  ;;  %v420_v5 = vld [vmem:[%s2104_s3 + $0xd8] sm:$0xff]  ;;  %v419_v9 = vld [vmem:[%s2104_s3 + $0xd0] sm:$0xff] }
  0x13   :  { %v453_v4 = vld [vmem:[%s2104_s3 + $0x1e0] sm:$0xff]  ;;  %v436_v6 = vld [vmem:[%s2104_s3 + $0x158] sm:$0xff]  ;;  %v435_v10 = vld [vmem:[%s2104_s3 + $0x150] sm:$0xff] }
  0x14   :  { %v452_v8 = vld [vmem:[%s2104_s3 + $0x1d8] sm:$0xff]  ;;  %v402_v11 = vld [vmem:[%s2104_s3 + $0x48] sm:$0xff]  ;;  %v451_v13 = vld [vmem:[%s2104_s3 + $0x1d0] sm:$0xff] }
  0x15   :  { %v418_v14 = vld [vmem:[%s2104_s3 + $0xc8] sm:$0xff]  ;;  %v401_v17 = vld [vmem:[%s2104_s3 + $0x40] sm:$0xff]  ;;  %v400_v20 = vld [vmem:[%s2104_s3 + $0x38] sm:$0xff] }
  0x16   :  { %v434_v15 = vld [vmem:[%s2104_s3 + $0x148] sm:$0xff]  ;;  %v417_v18 = vld [vmem:[%s2104_s3 + $0xc0] sm:$0xff]  ;;  %v416_v22 = vld [vmem:[%s2104_s3 + $0xb8] sm:$0xff] }
  0x17   :  { %v450_v16 = vld [vmem:[%s2104_s3 + $0x1c8] sm:$0xff]  ;;  %v433_v19 = vld [vmem:[%s2104_s3 + $0x140] sm:$0xff]  ;;  %v432_v23 = vld [vmem:[%s2104_s3 + $0x138] sm:$0xff] }
  0x18   :  { %1095 = vmatmul.msk.bf16.vlgmr.msrb.gmra.mxu0 %vm133_vm0, %v1179_v12  ;;  %1096 = vmatmul.msk.bf16.vlgmr.msrb.gmra.mxu1 %vm133_vm0, %v1179_v12  ;;  %v449_v21 = vld [vmem:[%s2104_s3 + $0x1c0] sm:$0xff]  ;;  %v399_v24 = vld [vmem:[%s2104_s3 + $0x30] sm:$0xff]  ;;  %v448_v25 = vld [vmem:[%s2104_s3 + $0x1b8] sm:$0xff] }
  0x19   :  { %1097 = vmatmul.msk.bf16.vlgmr.msrb.gmra.mxu2 %vm133_vm0, %v1179_v12  ;;  %312 = vmatpush.bf16.msrb.mxu0 %v1078_v48  ;;  %v431_v26 = vld [vmem:[%s2104_s3 + $0x130] sm:$0xff]  ;;  %v398_v27 = vld [vmem:[%s2104_s3 + $0x28] sm:$0xff]  ;;  %v397_v31 = vld [vmem:[%s2104_s3 + $0x20] sm:$0xff] }
  0x1a   :  { %1098 = vmatmul.msk.bf16.vlgmr.msrb.gmra.mxu3 %vm133_vm0, %v1179_v12  ;;  %326 = vmatpush.bf16.msrb.mxu1 %v1082_v49  ;;  %v447_v28 = vld [vmem:[%s2104_s3 + $0x1b0] sm:$0xff]  ;;  %v414_v29 = vld [vmem:[%s2104_s3 + $0xa8] sm:$0xff]  ;;  %v413_v33 = vld [vmem:[%s2104_s3 + $0xa0] sm:$0xff] }
  0x1b   :  { %340 = vmatpush.bf16.msrb.mxu2 %v1086_v50  ;;  %354 = vmatpush.bf16.msrb.mxu3 %v1090_v51  ;;  %v430_v30 = vld [vmem:[%s2104_s3 + $0x128] sm:$0xff]  ;;  %v429_v34 = vld [vmem:[%s2104_s3 + $0x120] sm:$0xff]  ;;  %v396_v35 = vld [vmem:[%s2104_s3 + $0x18] sm:$0xff] }
  0x1c   :  { %v446_v32 = vld [vmem:[%s2104_s3 + $0x1a8] sm:$0xff]  ;;  %v445_v36 = vld [vmem:[%s2104_s3 + $0x1a0] sm:$0xff]  ;;  %v412_v37 = vld [vmem:[%s2104_s3 + $0x98] sm:$0xff] }
  0x1d   :  { %v428_v38 = vld [vmem:[%s2104_s3 + $0x118] sm:$0xff]  ;;  %v395_v39 = vld [vmem:[%s2104_s3 + $0x10] sm:$0xff]  ;;  %v394_v43 = vld [vmem:[%s2104_s3 + $0x8] sm:$0xff] }
  0x1e   :  { %v444_v40 = vld [vmem:[%s2104_s3 + $0x198] sm:$0xff]  ;;  %v411_v41 = vld [vmem:[%s2104_s3 + $0x90] sm:$0xff]  ;;  %v410_v45 = vld [vmem:[%s2104_s3 + $0x88] sm:$0xff] }
  0x1f   :  { %v427_v42 = vld [vmem:[%s2104_s3 + $0x110] sm:$0xff]  ;;  %v426_v46 = vld [vmem:[%s2104_s3 + $0x108] sm:$0xff]  ;;  %v393_v47 = vld [vmem:[%s2104_s3] sm:$0xff] }
  0x20   :  { %v443_v44 = vld [vmem:[%s2104_s3 + $0x190] sm:$0xff]  ;;  %v442_v48 = vld [vmem:[%s2104_s3 + $0x188] sm:$0xff]  ;;  %v409_v49 = vld [vmem:[%s2104_s3 + $0x80] sm:$0xff] }
  0x21   :  { %v472_v50 = vld [vmem:[%s2104_s3 + $0x278] sm:$0xff] }
  0x22   :  { %v488_v51 = vld [vmem:[%s2104_s3 + $0x2f8] sm:$0xff] }
  0x28   :  { %1099 = vmatmul.msk.bf16.vlgmr.msra.gmra.mxu0 %vm133_vm0, %v1179_v12  ;;  %1100 = vmatmul.msk.bf16.vlgmr.msra.gmra.mxu1 %vm133_vm0, %v1179_v12 }
  0x29   :  { %1101 = vmatmul.msk.bf16.vlgmr.msra.gmra.mxu2 %vm133_vm0, %v1179_v12  ;;  %649 = vmatpush.msra.mxu0 %v408_v52  ;;  %v425_v52 = vld [vmem:[%s2104_s3 + $0x100] sm:$0xff] }
  0x2a   :  { %1102 = vmatmul.msk.bf16.vlgmr.msra.gmra.mxu3 %vm133_vm0, %v1179_v12  ;;  %672 = vmatpush.msra.mxu1 %v424_v53  ;;  %v471_v53 = vld [vmem:[%s2104_s3 + $0x270] sm:$0xff] }
  0x2b   :  { %695 = vmatpush.msra.mxu2 %v440_v54  ;;  %650 = vmatpush.msra.mxu0 %v407_v55  ;;  %v441_v54 = vld [vmem:[%s2104_s3 + $0x180] sm:$0xff]  ;;  %v487_v55 = vld [vmem:[%s2104_s3 + $0x2f0] sm:$0xff] }
  0x2c   :  { %718 = vmatpush.msra.mxu3 %v456_v56  ;;  %673 = vmatpush.msra.mxu1 %v423_v57  ;;  %v504_v56 = vld [vmem:[%s2104_s3 + $0x378] sm:$0xff]  ;;  %v470_v57 = vld [vmem:[%s2104_s3 + $0x268] sm:$0xff] }
  0x2d   :  { %696 = vmatpush.msra.mxu2 %v439_v58  ;;  %651 = vmatpush.msra.mxu0 %v406_v59  ;;  %v520_v58 = vld [vmem:[%s2104_s3 + $0x3f8] sm:$0xff]  ;;  %v486_v59 = vld [vmem:[%s2104_s3 + $0x2e8] sm:$0xff] }
  0x2e   :  { %719 = vmatpush.msra.mxu3 %v455_v60  ;;  %674 = vmatpush.msra.mxu1 %v422_v61  ;;  %v503_v60 = vld [vmem:[%s2104_s3 + $0x370] sm:$0xff]  ;;  %v469_v61 = vld [vmem:[%s2104_s3 + $0x260] sm:$0xff] }
  0x2f   :  { %697 = vmatpush.msra.mxu2 %v438_v62  ;;  %652 = vmatpush.msra.mxu0 %v405_v63  ;;  %v519_v62 = vld [vmem:[%s2104_s3 + $0x3f0] sm:$0xff]  ;;  %v485_v63 = vld [vmem:[%s2104_s3 + $0x2e0] sm:$0xff] }
  0x30   :  { %720 = vmatpush.msra.mxu3 %v454_v0  ;;  %675 = vmatpush.msra.mxu1 %v421_v1  ;;  %v502_v0 = vld [vmem:[%s2104_s3 + $0x368] sm:$0xff]  ;;  %v468_v1 = vld [vmem:[%s2104_s3 + $0x258] sm:$0xff] }
  0x31   :  { %698 = vmatpush.msra.mxu2 %v437_v2  ;;  %653 = vmatpush.msra.mxu0 %v404_v3  ;;  %v518_v2 = vld [vmem:[%s2104_s3 + $0x3e8] sm:$0xff]  ;;  %v484_v3 = vld [vmem:[%s2104_s3 + $0x2d8] sm:$0xff] }
  0x32   :  { %721 = vmatpush.msra.mxu3 %v453_v4  ;;  %676 = vmatpush.msra.mxu1 %v420_v5  ;;  %v501_v4 = vld [vmem:[%s2104_s3 + $0x360] sm:$0xff]  ;;  %v467_v5 = vld [vmem:[%s2104_s3 + $0x250] sm:$0xff] }
  0x33   :  { %699 = vmatpush.msra.mxu2 %v436_v6  ;;  %654 = vmatpush.msra.mxu0 %v403_v7  ;;  %v517_v6 = vld [vmem:[%s2104_s3 + $0x3e0] sm:$0xff]  ;;  %v483_v7 = vld [vmem:[%s2104_s3 + $0x2d0] sm:$0xff] }
  0x34   :  { %722 = vmatpush.msra.mxu3 %v452_v8  ;;  %677 = vmatpush.msra.mxu1 %v419_v9  ;;  %v500_v8 = vld [vmem:[%s2104_s3 + $0x358] sm:$0xff]  ;;  %v466_v9 = vld [vmem:[%s2104_s3 + $0x248] sm:$0xff] }
  0x35   :  { %700 = vmatpush.msra.mxu2 %v435_v10  ;;  %655 = vmatpush.msra.mxu0 %v402_v11  ;;  %v516_v10 = vld [vmem:[%s2104_s3 + $0x3d8] sm:$0xff]  ;;  %v482_v11 = vld [vmem:[%s2104_s3 + $0x2c8] sm:$0xff] }
  0x36   :  { %723 = vmatpush.msra.mxu3 %v451_v13  ;;  %678 = vmatpush.msra.mxu1 %v418_v14  ;;  %v499_v13 = vld [vmem:[%s2104_s3 + $0x350] sm:$0xff]  ;;  %v465_v14 = vld [vmem:[%s2104_s3 + $0x240] sm:$0xff] }
  0x37   :  { %701 = vmatpush.msra.mxu2 %v434_v15  ;;  %656 = vmatpush.msra.mxu0 %v401_v17  ;;  %v515_v15 = vld [vmem:[%s2104_s3 + $0x3d0] sm:$0xff]  ;;  %v498_v17 = vld [vmem:[%s2104_s3 + $0x348] sm:$0xff] }
  0x38   :  { %1103 = vmatmul.msk.bf16.vlgmr.msrb.gmra.mxu0 %vm133_vm0, %v1179_v12  ;;  %724 = vmatpush.msra.mxu3 %v450_v16  ;;  %v481_v16 = vld [vmem:[%s2104_s3 + $0x2c0] sm:$0xff] }
  0x39   :  { %1104 = vmatmul.msk.bf16.vlgmr.msrb.gmra.mxu1 %vm133_vm0, %v1179_v12  ;;  %1105 = vmatmul.msk.bf16.vlgmr.msrb.gmra.mxu2 %vm133_vm0, %v1179_v12 }
  0x3a   :  { %1106 = vmatmul.msk.bf16.vlgmr.msrb.gmra.mxu3 %vm133_vm0, %v1179_v12  ;;  %679 = vmatpush.msra.mxu1 %v417_v18  ;;  %v415_v12 = vld [vmem:[%s2104_s3 + $0xb0] sm:$0xff]  ;;  %v464_v18 = vld [vmem:[%s2104_s3 + $0x238] sm:$0xff] }
  0x3b   :  { %702 = vmatpush.msra.mxu2 %v433_v19  ;;  %657 = vmatpush.msra.mxu0 %v400_v20  ;;  %v514_v19 = vld [vmem:[%s2104_s3 + $0x3c8] sm:$0xff]  ;;  %v480_v20 = vld [vmem:[%s2104_s3 + $0x2b8] sm:$0xff] }
  0x3c   :  { %725 = vmatpush.msra.mxu3 %v449_v21  ;;  %680 = vmatpush.msra.mxu1 %v416_v22  ;;  %v497_v21 = vld [vmem:[%s2104_s3 + $0x340] sm:$0xff]  ;;  %v463_v22 = vld [vmem:[%s2104_s3 + $0x230] sm:$0xff] }
  0x3d   :  { %703 = vmatpush.msra.mxu2 %v432_v23  ;;  %658 = vmatpush.msra.mxu0 %v399_v24  ;;  %v513_v23 = vld [vmem:[%s2104_s3 + $0x3c0] sm:$0xff]  ;;  %v479_v24 = vld [vmem:[%s2104_s3 + $0x2b0] sm:$0xff] }
  0x3e   :  { %726 = vmatpush.msra.mxu3 %v448_v25  ;;  %681 = vmatpush.msra.mxu1 %v415_v12  ;;  %v496_v25 = vld [vmem:[%s2104_s3 + $0x338] sm:$0xff]  ;;  %v462_v12 = vld [vmem:[%s2104_s3 + $0x228] sm:$0xff] }
  0x3f   :  { %704 = vmatpush.msra.mxu2 %v431_v26  ;;  %659 = vmatpush.msra.mxu0 %v398_v27  ;;  %v512_v26 = vld [vmem:[%s2104_s3 + $0x3b8] sm:$0xff]  ;;  %v478_v27 = vld [vmem:[%s2104_s3 + $0x2a8] sm:$0xff] }
  0x40   :  { %727 = vmatpush.msra.mxu3 %v447_v28  ;;  %682 = vmatpush.msra.mxu1 %v414_v29  ;;  %v495_v28 = vld [vmem:[%s2104_s3 + $0x330] sm:$0xff]  ;;  %v461_v29 = vld [vmem:[%s2104_s3 + $0x220] sm:$0xff] }
  0x41   :  { %705 = vmatpush.msra.mxu2 %v430_v30  ;;  %660 = vmatpush.msra.mxu0 %v397_v31  ;;  %v511_v30 = vld [vmem:[%s2104_s3 + $0x3b0] sm:$0xff]  ;;  %v477_v31 = vld [vmem:[%s2104_s3 + $0x2a0] sm:$0xff] }
  0x42   :  { %728 = vmatpush.msra.mxu3 %v446_v32  ;;  %683 = vmatpush.msra.mxu1 %v413_v33  ;;  %v460_v32 = vld [vmem:[%s2104_s3 + $0x218] sm:$0xff] }
  0x43   :  { %706 = vmatpush.msra.mxu2 %v429_v34  ;;  %661 = vmatpush.msra.mxu0 %v396_v35  ;;  %v476_v33 = vld [vmem:[%s2104_s3 + $0x298] sm:$0xff]  ;;  %v459_v34 = vld [vmem:[%s2104_s3 + $0x210] sm:$0xff] }
  0x44   :  { %729 = vmatpush.msra.mxu3 %v445_v36  ;;  %684 = vmatpush.msra.mxu1 %v412_v37  ;;  %v475_v35 = vld [vmem:[%s2104_s3 + $0x290] sm:$0xff]  ;;  %v494_v36 = vld [vmem:[%s2104_s3 + $0x328] sm:$0xff] }
  0x45   :  { %707 = vmatpush.msra.mxu2 %v428_v38  ;;  %662 = vmatpush.msra.mxu0 %v395_v39  ;;  %v510_v37 = vld [vmem:[%s2104_s3 + $0x3a8] sm:$0xff] }
  0x46   :  { %730 = vmatpush.msra.mxu3 %v444_v40  ;;  %685 = vmatpush.msra.mxu1 %v411_v41  ;;  %v458_v38 = vld [vmem:[%s2104_s3 + $0x208] sm:$0xff]  ;;  %v493_v40 = vld [vmem:[%s2104_s3 + $0x320] sm:$0xff] }
  0x47   :  { %708 = vmatpush.msra.mxu2 %v427_v42  ;;  %663 = vmatpush.msra.mxu0 %v394_v43  ;;  %v474_v39 = vld [vmem:[%s2104_s3 + $0x288] sm:$0xff]  ;;  %v509_v41 = vld [vmem:[%s2104_s3 + $0x3a0] sm:$0xff] }
  0x48   :  { %731 = vmatpush.msra.mxu3 %v443_v44  ;;  %686 = vmatpush.msra.mxu1 %v410_v45  ;;  %v457_v42 = vld [vmem:[%s2104_s3 + $0x200] sm:$0xff]  ;;  %v492_v44 = vld [vmem:[%s2104_s3 + $0x318] sm:$0xff] }
  0x49   :  { %709 = vmatpush.msra.mxu2 %v426_v46  ;;  %664 = vmatpush.msra.mxu0 %v393_v47  ;;  %v473_v43 = vld [vmem:[%s2104_s3 + $0x280] sm:$0xff]  ;;  %v508_v45 = vld [vmem:[%s2104_s3 + $0x398] sm:$0xff]  ;;  %v491_v46 = vld [vmem:[%s2104_s3 + $0x310] sm:$0xff] }
  0x4a   :  { %732 = vmatpush.msra.mxu3 %v442_v48  ;;  %687 = vmatpush.msra.mxu1 %v409_v49  ;;  %v507_v47 = vld [vmem:[%s2104_s3 + $0x390] sm:$0xff]  ;;  %v490_v48 = vld [vmem:[%s2104_s3 + $0x308] sm:$0xff] }
  0x4b   :  { %741 = vmatpush.msrb.mxu0 %v472_v50  ;;  %710 = vmatpush.msra.mxu2 %v425_v52  ;;  %v506_v49 = vld [vmem:[%s2104_s3 + $0x388] sm:$0xff]  ;;  %v489_v50 = vld [vmem:[%s2104_s3 + $0x300] sm:$0xff] }
  0x4c   :  { %764 = vmatpush.msrb.mxu1 %v488_v51  ;;  %733 = vmatpush.msra.mxu3 %v441_v54  ;;  %v505_v51 = vld [vmem:[%s2104_s3 + $0x380] sm:$0xff] }
  0x4d   :  { %742 = vmatpush.msrb.mxu0 %v471_v53  ;;  %787 = vmatpush.msrb.mxu2 %v504_v56 }
  0x4e   :  { %765 = vmatpush.msrb.mxu1 %v487_v55  ;;  %810 = vmatpush.msrb.mxu3 %v520_v58  ;;  %v536_v58 = vld [vmem:[%s2104_s3 + $0x478] sm:$0xff] }
  0x4f   :  { %743 = vmatpush.msrb.mxu0 %v470_v57  ;;  %788 = vmatpush.msrb.mxu2 %v503_v60  ;;  %v552_v60 = vld [vmem:[%s2104_s3 + $0x4f8] sm:$0xff] }
  0x50   :  { %766 = vmatpush.msrb.mxu1 %v486_v59  ;;  %811 = vmatpush.msrb.mxu3 %v519_v62  ;;  %v551_v62 = vld [vmem:[%s2104_s3 + $0x4f0] sm:$0xff] }
  0x51   :  { %744 = vmatpush.msrb.mxu0 %v469_v61  ;;  %789 = vmatpush.msrb.mxu2 %v502_v0  ;;  %v535_v61 = vld [vmem:[%s2104_s3 + $0x470] sm:$0xff] }
  0x52   :  { %767 = vmatpush.msrb.mxu1 %v485_v63  ;;  %812 = vmatpush.msrb.mxu3 %v518_v2 }
  0x53   :  { %745 = vmatpush.msrb.mxu0 %v468_v1  ;;  %790 = vmatpush.msrb.mxu2 %v501_v4  ;;  %v534_v1 = vld [vmem:[%s2104_s3 + $0x468] sm:$0xff] }
  0x54   :  { %768 = vmatpush.msrb.mxu1 %v484_v3  ;;  %813 = vmatpush.msrb.mxu3 %v517_v6 }
  0x55   :  { %746 = vmatpush.msrb.mxu0 %v467_v5  ;;  %791 = vmatpush.msrb.mxu2 %v500_v8  ;;  %v550_v5 = vld [vmem:[%s2104_s3 + $0x4e8] sm:$0xff] }
  0x56   :  { %769 = vmatpush.msrb.mxu1 %v483_v7  ;;  %814 = vmatpush.msrb.mxu3 %v516_v10 }
  0x57   :  { %747 = vmatpush.msrb.mxu0 %v466_v9  ;;  %792 = vmatpush.msrb.mxu2 %v499_v13  ;;  %v533_v9 = vld [vmem:[%s2104_s3 + $0x460] sm:$0xff] }
  0x58   :  { %770 = vmatpush.msrb.mxu1 %v482_v11  ;;  %815 = vmatpush.msrb.mxu3 %v515_v15  ;;  %v549_v13 = vld [vmem:[%s2104_s3 + $0x4e0] sm:$0xff] }
  0x59   :  { %748 = vmatpush.msrb.mxu0 %v465_v14  ;;  %793 = vmatpush.msrb.mxu2 %v498_v17  ;;  %v584_v17 = vld [vmem:[%s2104_s3 + $0x5f8] sm:$0xff] }
  0x5a   :  { %771 = vmatpush.msrb.mxu1 %v481_v16  ;;  %816 = vmatpush.msrb.mxu3 %v514_v19  ;;  %v568_v16 = vld [vmem:[%s2104_s3 + $0x578] sm:$0xff] }
  0x5b   :  { %749 = vmatpush.msrb.mxu0 %v464_v18  ;;  %794 = vmatpush.msrb.mxu2 %v497_v21  ;;  %v532_v19 = vld [vmem:[%s2104_s3 + $0x458] sm:$0xff]  ;;  %v567_v21 = vld [vmem:[%s2104_s3 + $0x570] sm:$0xff] }
  0x5c   :  { %772 = vmatpush.msrb.mxu1 %v480_v20  ;;  %817 = vmatpush.msrb.mxu3 %v513_v23  ;;  %v548_v20 = vld [vmem:[%s2104_s3 + $0x4d8] sm:$0xff] }
  0x5d   :  { %750 = vmatpush.msrb.mxu0 %v463_v22  ;;  %795 = vmatpush.msrb.mxu2 %v496_v25  ;;  %v583_v22 = vld [vmem:[%s2104_s3 + $0x5f0] sm:$0xff] }
  0x5e   :  { %773 = vmatpush.msrb.mxu1 %v479_v24  ;;  %818 = vmatpush.msrb.mxu3 %v512_v26  ;;  %v531_v24 = vld [vmem:[%s2104_s3 + $0x450] sm:$0xff] }
  0x5f   :  { %751 = vmatpush.msrb.mxu0 %v462_v12  ;;  %796 = vmatpush.msrb.mxu2 %v495_v28  ;;  %v547_v25 = vld [vmem:[%s2104_s3 + $0x4d0] sm:$0xff]  ;;  %v582_v28 = vld [vmem:[%s2104_s3 + $0x5e8] sm:$0xff] }
  0x60   :  { %774 = vmatpush.msrb.mxu1 %v478_v27  ;;  %819 = vmatpush.msrb.mxu3 %v511_v30  ;;  %v566_v27 = vld [vmem:[%s2104_s3 + $0x568] sm:$0xff] }
  0x61   :  { %752 = vmatpush.msrb.mxu0 %v461_v29  ;;  %797 = vmatpush.msrb.mxu2 %v494_v36 }
  0x62   :  { %775 = vmatpush.msrb.mxu1 %v477_v31  ;;  %820 = vmatpush.msrb.mxu3 %v510_v37  ;;  %v565_v37 = vld [vmem:[%s2104_s3 + $0x560] sm:$0xff] }
  0x63   :  { %753 = vmatpush.msrb.mxu0 %v460_v32  ;;  %798 = vmatpush.msrb.mxu2 %v493_v40  ;;  %v529_v40 = vld [vmem:[%s2104_s3 + $0x440] sm:$0xff] }
  0x64   :  { %776 = vmatpush.msrb.mxu1 %v476_v33  ;;  %821 = vmatpush.msrb.mxu3 %v509_v41  ;;  %v530_v33 = vld [vmem:[%s2104_s3 + $0x448] sm:$0xff]  ;;  %v545_v41 = vld [vmem:[%s2104_s3 + $0x4c0] sm:$0xff] }
  0x65   :  { %754 = vmatpush.msrb.mxu0 %v459_v34  ;;  %799 = vmatpush.msrb.mxu2 %v492_v44  ;;  %v546_v34 = vld [vmem:[%s2104_s3 + $0x4c8] sm:$0xff]  ;;  %v564_v44 = vld [vmem:[%s2104_s3 + $0x558] sm:$0xff] }
  0x66   :  { %777 = vmatpush.msrb.mxu1 %v475_v35  ;;  %822 = vmatpush.msrb.mxu3 %v508_v45  ;;  %v580_v45 = vld [vmem:[%s2104_s3 + $0x5d8] sm:$0xff] }
  0x67   :  { %755 = vmatpush.msrb.mxu0 %v458_v38  ;;  %800 = vmatpush.msrb.mxu2 %v491_v46  ;;  %v581_v38 = vld [vmem:[%s2104_s3 + $0x5e0] sm:$0xff]  ;;  %v528_v46 = vld [vmem:[%s2104_s3 + $0x438] sm:$0xff] }
  0x68   :  { %778 = vmatpush.msrb.mxu1 %v474_v39  ;;  %823 = vmatpush.msrb.mxu3 %v507_v47  ;;  %v544_v47 = vld [vmem:[%s2104_s3 + $0x4b8] sm:$0xff] }
  0x69   :  { %756 = vmatpush.msrb.mxu0 %v457_v42  ;;  %801 = vmatpush.msrb.mxu2 %v490_v48 }
  0x6a   :  { %779 = vmatpush.msrb.mxu1 %v473_v43  ;;  %824 = vmatpush.msrb.mxu3 %v506_v49  ;;  %v563_v49 = vld [vmem:[%s2104_s3 + $0x550] sm:$0xff] }
  0x6b   :  { %802 = vmatpush.msrb.mxu2 %v489_v50  ;;  %v579_v50 = vld [vmem:[%s2104_s3 + $0x5d0] sm:$0xff] }
  0x6c   :  { %825 = vmatpush.msrb.mxu3 %v505_v51 }
  0x78   :  { %v1675_v52 = vpop.permute.xlu0 %40 }
  0x80   :  { %v1691_v63 = vpop.permute.xlu0 %45 }
  0x85   :  { %v146_v53 = vpop.f32.mrf.mxu0  ;;  %v160_v55 = vpop.f32.mrf.mxu1 }
  0x86   :  { %v147_v54 = vadd.f32 %v146_v53, %v1675_v52  ;;  %v161_v56 = vadd.f32 %v160_v55, %v1675_v52 }
  0x88   :  { %v361_v57 = vmax.f32 %v147_v54, 0.0  ;;  %v362_v59 = vmax.f32 %v161_v56, 0.0  ;;  %v527_v56 = vld [vmem:[%s2104_s3 + $0x430] sm:$0xff] }
  0x8a   :  { %665 = vmatmul.f32.vlgmr.msra.gmra.mxu0 %v361_v57  ;;  %688 = vmatmul.f32.vlgmr.msra.gmra.mxu1 %v362_v59  ;;  %v543_v57 = vld [vmem:[%s2104_s3 + $0x4b0] sm:$0xff]  ;;  %v562_v59 = vld [vmem:[%s2104_s3 + $0x548] sm:$0xff] }
  0x8b   :  { %833 = vmatpush.msra.mxu0 %v536_v58  ;;  %856 = vmatpush.msra.mxu1 %v552_v60  ;;  %v578_v60 = vld [vmem:[%s2104_s3 + $0x5c8] sm:$0xff] }
  0x8c   :  { %v174_v0 = vpop.f32.mrf.mxu2 }
  0x8d   :  { %v175_v2 = vadd.f32 %v174_v0, %v1675_v52  ;;  %v188_v3 = vpop.f32.mrf.mxu3  ;;  %834 = vmatpush.msra.mxu0 %v535_v61  ;;  %v148_v4 = vpop.f32.mrf.mxu0  ;;  %857 = vmatpush.msra.mxu1 %v551_v62  ;;  %v526_v0 = vld [vmem:[%s2104_s3 + $0x428] sm:$0xff] }
  0x8e   :  { %v189_v6 = vadd.f32 %v188_v3, %v1675_v52  ;;  %v149_v7 = vadd.f32 %v148_v4, %v1691_v63  ;;  %v162_v8 = vpop.f32.mrf.mxu1  ;;  %v561_v4 = vld [vmem:[%s2104_s3 + $0x540] sm:$0xff] }
  0x8f   :  { %v363_v10 = vmax.f32 %v175_v2, 0.0  ;;  %v163_v11 = vadd.f32 %v162_v8, %v1691_v63  ;;  %835 = vmatpush.msra.mxu0 %v534_v1  ;;  %858 = vmatpush.msra.mxu1 %v550_v5  ;;  %v542_v1 = vld [vmem:[%s2104_s3 + $0x4a8] sm:$0xff]  ;;  %v577_v5 = vld [vmem:[%s2104_s3 + $0x5c0] sm:$0xff] }
  0x90   :  { %v364_v14 = vmax.f32 %v189_v6, 0.0  ;;  %v377_v15 = vmax.f32 %v149_v7, 0.0  ;;  %v525_v6 = vld [vmem:[%s2104_s3 + $0x420] sm:$0xff] }
  0x91   :  { %v378_v18 = vmax.f32 %v163_v11, 0.0  ;;  %711 = vmatmul.f32.vlgmr.msra.gmra.mxu2 %v363_v10  ;;  %836 = vmatpush.msra.mxu0 %v533_v9  ;;  %v541_v7 = vld [vmem:[%s2104_s3 + $0x4a0] sm:$0xff]  ;;  %v560_v10 = vld [vmem:[%s2104_s3 + $0x538] sm:$0xff] }
  0x92   :  { %734 = vmatmul.f32.vlgmr.msra.gmra.mxu3 %v364_v14  ;;  %859 = vmatpush.msra.mxu1 %v549_v13  ;;  %v576_v11 = vld [vmem:[%s2104_s3 + $0x5b8] sm:$0xff] }
  0x93   :  { %879 = vmatpush.msra.mxu2 %v568_v16  ;;  %902 = vmatpush.msra.mxu3 %v584_v17  ;;  %v540_v16 = vld [vmem:[%s2104_s3 + $0x498] sm:$0xff]  ;;  %v559_v17 = vld [vmem:[%s2104_s3 + $0x530] sm:$0xff] }
  0x94   :  { %668 = vmatmul.f32.gmra.mxu0 %v377_v15  ;;  %691 = vmatmul.f32.gmra.mxu1 %v378_v18  ;;  %v176_v23 = vpop.f32.mrf.mxu2  ;;  %v524_v15 = vld [vmem:[%s2104_s3 + $0x418] sm:$0xff]  ;;  %v575_v18 = vld [vmem:[%s2104_s3 + $0x5b0] sm:$0xff] }
  0x95   :  { %837 = vmatpush.msra.mxu0 %v532_v19  ;;  %860 = vmatpush.msra.mxu1 %v548_v20  ;;  %v177_v12 = vadd.f32 %v176_v23, %v1691_v63  ;;  %v190_v26 = vpop.f32.mrf.mxu3  ;;  %v202_v29 = vpop.f32.mrf.mxu0 }
  0x96   :  { %880 = vmatpush.msra.mxu2 %v567_v21  ;;  %903 = vmatpush.msra.mxu3 %v583_v22  ;;  %v191_v30 = vadd.f32 %v190_v26, %v1691_v63  ;;  %v203_v31 = vadd.f32 %v202_v29, %v1675_v52  ;;  %v216_v32 = vpop.f32.mrf.mxu1  ;;  %v523_v21 = vld [vmem:[%s2104_s3 + $0x410] sm:$0xff]  ;;  %v522_v26 = vld [vmem:[%s2104_s3 + $0x408] sm:$0xff] }
  0x97   :  { %v379_v35 = vmax.f32 %v177_v12, 0.0  ;;  %838 = vmatpush.msra.mxu0 %v531_v24  ;;  %861 = vmatpush.msra.mxu1 %v547_v25  ;;  %v217_v36 = vadd.f32 %v216_v32, %v1675_v52  ;;  %v539_v22 = vld [vmem:[%s2104_s3 + $0x490] sm:$0xff]  ;;  %v558_v25 = vld [vmem:[%s2104_s3 + $0x528] sm:$0xff]  ;;  %v557_v32 = vld [vmem:[%s2104_s3 + $0x520] sm:$0xff] }
  0x98   :  { %v380_v39 = vmax.f32 %v191_v30, 0.0  ;;  %881 = vmatpush.msra.mxu2 %v566_v27  ;;  %904 = vmatpush.msra.mxu3 %v582_v28  ;;  %v365_v42 = vmax.f32 %v203_v31, 0.0  ;;  %v574_v12 = vld [vmem:[%s2104_s3 + $0x5a8] sm:$0xff] }
  0x99   :  { %839 = vmatpush.msra.mxu0 %v530_v33  ;;  %862 = vmatpush.msra.mxu1 %v546_v34  ;;  %v366_v43 = vmax.f32 %v217_v36, 0.0  ;;  %v538_v27 = vld [vmem:[%s2104_s3 + $0x488] sm:$0xff]  ;;  %v573_v33 = vld [vmem:[%s2104_s3 + $0x5a0] sm:$0xff]  ;;  %v556_v36 = vld [vmem:[%s2104_s3 + $0x518] sm:$0xff] }
  0x9a   :  { %882 = vmatpush.msra.mxu2 %v565_v37  ;;  %905 = vmatpush.msra.mxu3 %v581_v38  ;;  %v521_v34 = vld [vmem:[%s2104_s3 + $0x400] sm:$0xff]  ;;  %v572_v37 = vld [vmem:[%s2104_s3 + $0x598] sm:$0xff] }
  0x9b   :  { %714 = vmatmul.f32.gmra.mxu2 %v379_v35  ;;  %737 = vmatmul.f32.gmra.mxu3 %v380_v39  ;;  %v537_v35 = vld [vmem:[%s2104_s3 + $0x480] sm:$0xff] }
  0x9c   :  { %840 = vmatpush.msra.mxu0 %v529_v40  ;;  %863 = vmatpush.msra.mxu1 %v545_v41  ;;  %v230_v48 = vpop.f32.mrf.mxu2  ;;  %v600_v40 = vld [vmem:[%s2104_s3 + $0x678] sm:$0xff] }
  0x9d   :  { %883 = vmatpush.msra.mxu2 %v564_v44  ;;  %906 = vmatpush.msra.mxu3 %v580_v45  ;;  %v231_v51 = vadd.f32 %v230_v48, %v1675_v52  ;;  %v244_v53 = vpop.f32.mrf.mxu3  ;;  %v204_v54 = vpop.f32.mrf.mxu0  ;;  %v616_v41 = vld [vmem:[%s2104_s3 + $0x6f8] sm:$0xff]  ;;  %v555_v44 = vld [vmem:[%s2104_s3 + $0x510] sm:$0xff] }
  0x9e   :  { %757 = vmatmul.f32.vlgmr.msrb.gmra.mxu0 %v365_v42  ;;  %780 = vmatmul.f32.vlgmr.msrb.gmra.mxu1 %v366_v43  ;;  %v245_v55 = vadd.f32 %v244_v53, %v1675_v52  ;;  %v218_v58 = vpop.f32.mrf.mxu1  ;;  %v205_v61 = vadd.f32 %v204_v54, %v1691_v63  ;;  %v571_v45 = vld [vmem:[%s2104_s3 + $0x590] sm:$0xff] }
  0x9f   :  { %841 = vmatpush.msra.mxu0 %v528_v46  ;;  %864 = vmatpush.msra.mxu1 %v544_v47  ;;  %v219_v62 = vadd.f32 %v218_v58, %v1691_v63  ;;  %v367_v2 = vmax.f32 %v231_v51, 0.0  ;;  %v599_v46 = vld [vmem:[%s2104_s3 + $0x670] sm:$0xff]  ;;  %v570_v51 = vld [vmem:[%s2104_s3 + $0x588] sm:$0xff]  ;;  %v569_v58 = vld [vmem:[%s2104_s3 + $0x580] sm:$0xff] }
  0xa0   :  { %884 = vmatpush.msra.mxu2 %v563_v49  ;;  %907 = vmatpush.msra.mxu3 %v579_v50  ;;  %v368_v3 = vmax.f32 %v245_v55, 0.0  ;;  %v381_v8 = vmax.f32 %v205_v61, 0.0  ;;  %v615_v47 = vld [vmem:[%s2104_s3 + $0x6f0] sm:$0xff]  ;;  %v554_v50 = vld [vmem:[%s2104_s3 + $0x508] sm:$0xff]  ;;  %v597_v61 = vld [vmem:[%s2104_s3 + $0x660] sm:$0xff] }
  0xa1   :  { %842 = vmatpush.msra.mxu0 %v527_v56  ;;  %865 = vmatpush.msra.mxu1 %v543_v57  ;;  %v382_v9 = vmax.f32 %v219_v62, 0.0  ;;  %v598_v55 = vld [vmem:[%s2104_s3 + $0x668] sm:$0xff]  ;;  %v553_v57 = vld [vmem:[%s2104_s3 + $0x500] sm:$0xff] }
  0xa2   :  { %885 = vmatpush.msra.mxu2 %v562_v59  ;;  %908 = vmatpush.msra.mxu3 %v578_v60  ;;  %v614_v56 = vld [vmem:[%s2104_s3 + $0x6e8] sm:$0xff]  ;;  %v613_v62 = vld [vmem:[%s2104_s3 + $0x6e0] sm:$0xff] }
  0xa3   :  { %843 = vmatpush.msra.mxu0 %v526_v0  ;;  %866 = vmatpush.msra.mxu1 %v542_v1 }
  0xa4   :  { %886 = vmatpush.msra.mxu2 %v561_v4  ;;  %909 = vmatpush.msra.mxu3 %v577_v5  ;;  %v232_v13 = vpop.f32.mrf.mxu2  ;;  %v596_v4 = vld [vmem:[%s2104_s3 + $0x658] sm:$0xff] }
  0xa5   :  { %803 = vmatmul.f32.vlgmr.msrb.gmra.mxu2 %v367_v2  ;;  %826 = vmatmul.f32.vlgmr.msrb.gmra.mxu3 %v368_v3  ;;  %v246_v14 = vpop.f32.mrf.mxu3  ;;  %v233_v19 = vadd.f32 %v232_v13, %v1691_v63  ;;  %v258_v23 = vpop.f32.mrf.mxu0  ;;  %v632_v2 = vld [vmem:[%s2104_s3 + $0x778] sm:$0xff]  ;;  %v595_v13 = vld [vmem:[%s2104_s3 + $0x650] sm:$0xff] }
  0xa6   :  { %844 = vmatpush.msra.mxu0 %v525_v6  ;;  %867 = vmatpush.msra.mxu1 %v541_v7  ;;  %v247_v20 = vadd.f32 %v246_v14, %v1691_v63  ;;  %v272_v24 = vpop.f32.mrf.mxu1  ;;  %v259_v30 = vadd.f32 %v258_v23, %v1675_v52  ;;  %v648_v3 = vld [vmem:[%s2104_s3 + $0x7f8] sm:$0xff]  ;;  %v611_v14 = vld [vmem:[%s2104_s3 + $0x6d0] sm:$0xff]  ;;  %v593_v23 = vld [vmem:[%s2104_s3 + $0x640] sm:$0xff] }
  0xa7   :  { %887 = vmatpush.msra.mxu2 %v560_v10  ;;  %910 = vmatpush.msra.mxu3 %v576_v11  ;;  %v383_v28 = vmax.f32 %v233_v19, 0.0  ;;  %v273_v31 = vadd.f32 %v272_v24, %v1675_v52  ;;  %v612_v5 = vld [vmem:[%s2104_s3 + $0x6d8] sm:$0xff]  ;;  %v594_v19 = vld [vmem:[%s2104_s3 + $0x648] sm:$0xff]  ;;  %v609_v24 = vld [vmem:[%s2104_s3 + $0x6c0] sm:$0xff] }
  0xa8   :  { %760 = vmatmul.f32.gmra.mxu0 %v381_v8  ;;  %783 = vmatmul.f32.gmra.mxu1 %v382_v9  ;;  %v384_v29 = vmax.f32 %v247_v20, 0.0  ;;  %v369_v38 = vmax.f32 %v259_v30, 0.0  ;;  %v631_v8 = vld [vmem:[%s2104_s3 + $0x770] sm:$0xff]  ;;  %v610_v20 = vld [vmem:[%s2104_s3 + $0x6c8] sm:$0xff] }
  0xa9   :  { %845 = vmatpush.msra.mxu0 %v524_v15  ;;  %868 = vmatpush.msra.mxu1 %v540_v16  ;;  %v370_v39 = vmax.f32 %v273_v31, 0.0  ;;  %v647_v9 = vld [vmem:[%s2104_s3 + $0x7f0] sm:$0xff] }
  0xaa   :  { %888 = vmatpush.msra.mxu2 %v559_v17  ;;  %911 = vmatpush.msra.mxu3 %v575_v18  ;;  %v630_v17 = vld [vmem:[%s2104_s3 + $0x768] sm:$0xff]  ;;  %v627_v30 = vld [vmem:[%s2104_s3 + $0x750] sm:$0xff] }
  0xab   :  { %846 = vmatpush.msra.mxu0 %v523_v21  ;;  %869 = vmatpush.msra.mxu1 %v539_v22  ;;  %v646_v18 = vld [vmem:[%s2104_s3 + $0x7e8] sm:$0xff]  ;;  %v629_v21 = vld [vmem:[%s2104_s3 + $0x760] sm:$0xff]  ;;  %v643_v31 = vld [vmem:[%s2104_s3 + $0x7d0] sm:$0xff] }
  0xac   :  { %889 = vmatpush.msra.mxu2 %v558_v25  ;;  %912 = vmatpush.msra.mxu3 %v574_v12  ;;  %v286_v42 = vpop.f32.mrf.mxu2  ;;  %v645_v22 = vld [vmem:[%s2104_s3 + $0x7e0] sm:$0xff] }
  0xad   :  { %847 = vmatpush.msra.mxu0 %v522_v26  ;;  %870 = vmatpush.msra.mxu1 %v538_v27  ;;  %v300_v43 = vpop.f32.mrf.mxu3  ;;  %v287_v48 = vadd.f32 %v286_v42, %v1675_v52  ;;  %v260_v53 = vpop.f32.mrf.mxu0  ;;  %v628_v26 = vld [vmem:[%s2104_s3 + $0x758] sm:$0xff] }
  0xae   :  { %890 = vmatpush.msra.mxu2 %v557_v32  ;;  %913 = vmatpush.msra.mxu3 %v573_v33  ;;  %v301_v49 = vadd.f32 %v300_v43, %v1675_v52  ;;  %v274_v54 = vpop.f32.mrf.mxu1  ;;  %v261_v59 = vadd.f32 %v260_v53, %v1691_v63  ;;  %v644_v27 = vld [vmem:[%s2104_s3 + $0x7d8] sm:$0xff]  ;;  %v591_v32 = vld [vmem:[%s2104_s3 + $0x630] sm:$0xff]  ;;  %v622_v53 = vld [vmem:[%s2104_s3 + $0x728] sm:$0xff] }
  0xaf   :  { %806 = vmatmul.f32.gmra.mxu2 %v383_v28  ;;  %829 = vmatmul.f32.gmra.mxu3 %v384_v29  ;;  %v275_v60 = vadd.f32 %v274_v54, %v1691_v63  ;;  %v371_v0 = vmax.f32 %v287_v48, 0.0  ;;  %v592_v28 = vld [vmem:[%s2104_s3 + $0x638] sm:$0xff]  ;;  %v607_v33 = vld [vmem:[%s2104_s3 + $0x6b0] sm:$0xff]  ;;  %v638_v54 = vld [vmem:[%s2104_s3 + $0x7a8] sm:$0xff] }
  0xb0   :  { %848 = vmatpush.msra.mxu0 %v521_v34  ;;  %871 = vmatpush.msra.mxu1 %v537_v35  ;;  %v372_v1 = vmax.f32 %v301_v49, 0.0  ;;  %v385_v6 = vmax.f32 %v261_v59, 0.0  ;;  %v608_v29 = vld [vmem:[%s2104_s3 + $0x6b8] sm:$0xff]  ;;  %v626_v34 = vld [vmem:[%s2104_s3 + $0x748] sm:$0xff]  ;;  %v623_v48 = vld [vmem:[%s2104_s3 + $0x730] sm:$0xff] }
  0xb1   :  { %891 = vmatpush.msra.mxu2 %v556_v36  ;;  %914 = vmatpush.msra.mxu3 %v572_v37  ;;  %v386_v7 = vmax.f32 %v275_v60, 0.0  ;;  %v642_v35 = vld [vmem:[%s2104_s3 + $0x7c8] sm:$0xff]  ;;  %v624_v42 = vld [vmem:[%s2104_s3 + $0x738] sm:$0xff]  ;;  %v639_v49 = vld [vmem:[%s2104_s3 + $0x7b0] sm:$0xff] }
  0xb2   :  { %925 = vmatpush.msrb.mxu0 %v600_v40  ;;  %948 = vmatpush.msrb.mxu1 %v616_v41  ;;  %v590_v36 = vld [vmem:[%s2104_s3 + $0x628] sm:$0xff]  ;;  %v589_v40 = vld [vmem:[%s2104_s3 + $0x620] sm:$0xff]  ;;  %v640_v43 = vld [vmem:[%s2104_s3 + $0x7b8] sm:$0xff] }
  0xb3   :  { %849 = vmatmul.f32.vlgmr.msra.gmra.mxu0 %v369_v38  ;;  %872 = vmatmul.f32.vlgmr.msra.gmra.mxu1 %v370_v39  ;;  %v606_v37 = vld [vmem:[%s2104_s3 + $0x6a8] sm:$0xff]  ;;  %v625_v38 = vld [vmem:[%s2104_s3 + $0x740] sm:$0xff] }
  0xb4   :  { %892 = vmatpush.msra.mxu2 %v555_v44  ;;  %915 = vmatpush.msra.mxu3 %v571_v45  ;;  %v288_v10 = vpop.f32.mrf.mxu2  ;;  %v641_v39 = vld [vmem:[%s2104_s3 + $0x7c0] sm:$0xff] }
  0xb5   :  { %926 = vmatpush.msrb.mxu0 %v599_v46  ;;  %949 = vmatpush.msrb.mxu1 %v615_v47  ;;  %v302_v11 = vpop.f32.mrf.mxu3  ;;  %v289_v15 = vadd.f32 %v288_v10, %v1691_v63  ;;  %v605_v41 = vld [vmem:[%s2104_s3 + $0x6a0] sm:$0xff]  ;;  %v314_v44 = vpop.f32.mrf.mxu0  ;;  %v588_v46 = vld [vmem:[%s2104_s3 + $0x618] sm:$0xff] }
  0xb6   :  { %893 = vmatpush.msra.mxu2 %v554_v50  ;;  %916 = vmatpush.msra.mxu3 %v570_v51  ;;  %v303_v16 = vadd.f32 %v302_v11, %v1691_v63  ;;  %v328_v45 = vpop.f32.mrf.mxu1  ;;  %v604_v47 = vld [vmem:[%s2104_s3 + $0x698] sm:$0xff]  ;;  %v587_v50 = vld [vmem:[%s2104_s3 + $0x610] sm:$0xff]  ;;  %v621_v59 = vld [vmem:[%s2104_s3 + $0x720] sm:$0xff] }
  0xb7   :  { %927 = vmatpush.msrb.mxu0 %v598_v55  ;;  %950 = vmatpush.msrb.mxu1 %v614_v56  ;;  %v387_v25 = vmax.f32 %v289_v15, 0.0  ;;  %v603_v51 = vld [vmem:[%s2104_s3 + $0x690] sm:$0xff]  ;;  %v586_v55 = vld [vmem:[%s2104_s3 + $0x608] sm:$0xff]  ;;  %v637_v60 = vld [vmem:[%s2104_s3 + $0x7a0] sm:$0xff] }
  0xb8   :  { %894 = vmatpush.msra.mxu2 %v553_v57  ;;  %917 = vmatpush.msra.mxu3 %v569_v58  ;;  %v388_v12 = vmax.f32 %v303_v16, 0.0  ;;  %v602_v56 = vld [vmem:[%s2104_s3 + $0x688] sm:$0xff]  ;;  %v315_v57 = vadd.f32 %v314_v44, %v1675_v52  ;;  %v329_v58 = vadd.f32 %v328_v45, %v1675_v52 }
  0xb9   :  { %928 = vmatpush.msrb.mxu0 %v597_v61  ;;  %951 = vmatpush.msrb.mxu1 %v613_v62 }
  0xba   :  { %971 = vmatpush.msrb.mxu2 %v632_v2  ;;  %994 = vmatpush.msrb.mxu3 %v648_v3  ;;  %v620_v2 = vld [vmem:[%s2104_s3 + $0x718] sm:$0xff] }
  0xbb   :  { %895 = vmatmul.f32.vlgmr.msra.gmra.mxu2 %v371_v0  ;;  %918 = vmatmul.f32.vlgmr.msra.gmra.mxu3 %v372_v1  ;;  %v585_v0 = vld [vmem:[%s2104_s3 + $0x600] sm:$0xff]  ;;  %v636_v3 = vld [vmem:[%s2104_s3 + $0x798] sm:$0xff] }
  0xbc   :  { %929 = vmatpush.msrb.mxu0 %v596_v4  ;;  %952 = vmatpush.msrb.mxu1 %v612_v5  ;;  %v342_v61 = vpop.f32.mrf.mxu2  ;;  %v601_v1 = vld [vmem:[%s2104_s3 + $0x680] sm:$0xff]  ;;  %v373_v4 = vmax.f32 %v315_v57, 0.0  ;;  %v374_v5 = vmax.f32 %v329_v58, 0.0 }
  0xbd   :  { %972 = vmatpush.msrb.mxu2 %v631_v8  ;;  %995 = vmatpush.msrb.mxu3 %v647_v9  ;;  %v356_v62 = vpop.f32.mrf.mxu3  ;;  %v316_v8 = vpop.f32.mrf.mxu0  ;;  %v343_v10 = vadd.f32 %v342_v61, %v1675_v52 }
  0xbe   :  { %852 = vmatmul.f32.gmra.mxu0 %v385_v6  ;;  %875 = vmatmul.f32.gmra.mxu1 %v386_v7  ;;  %v619_v6 = vld [vmem:[%s2104_s3 + $0x710] sm:$0xff]  ;;  %v330_v9 = vpop.f32.mrf.mxu1  ;;  %v357_v11 = vadd.f32 %v356_v62, %v1675_v52  ;;  %v317_v15 = vadd.f32 %v316_v8, %v1691_v63  ;;  %v617_v52 = vld [vmem:[%s2104_s3 + $0x700] sm:$0xff] }
  0xbf   :  { %930 = vmatpush.msrb.mxu0 %v595_v13  ;;  %953 = vmatpush.msrb.mxu1 %v611_v14  ;;  %v635_v7 = vld [vmem:[%s2104_s3 + $0x790] sm:$0xff]  ;;  %v618_v13 = vld [vmem:[%s2104_s3 + $0x708] sm:$0xff]  ;;  %v331_v16 = vadd.f32 %v330_v9, %v1691_v63 }
  0xc0   :  { %973 = vmatpush.msrb.mxu2 %v630_v17  ;;  %996 = vmatpush.msrb.mxu3 %v646_v18  ;;  %v634_v14 = vld [vmem:[%s2104_s3 + $0x788] sm:$0xff]  ;;  %v633_v17 = vld [vmem:[%s2104_s3 + $0x780] sm:$0xff]  ;;  %v375_v18 = vmax.f32 %v343_v10, 0.0 }
  0xc1   :  { %931 = vmatpush.msrb.mxu0 %v594_v19  ;;  %954 = vmatpush.msrb.mxu1 %v610_v20  ;;  %v376_v19 = vmax.f32 %v357_v11, 0.0 }
  0xc2   :  { %974 = vmatpush.msrb.mxu2 %v629_v21  ;;  %997 = vmatpush.msrb.mxu3 %v645_v22  ;;  %v389_v22 = vmax.f32 %v317_v15, 0.0 }
  0xc3   :  { %932 = vmatpush.msrb.mxu0 %v593_v23  ;;  %955 = vmatpush.msrb.mxu1 %v609_v24  ;;  %v390_v23 = vmax.f32 %v331_v16, 0.0 }
  0xc4   :  { %975 = vmatpush.msrb.mxu2 %v628_v26  ;;  %998 = vmatpush.msrb.mxu3 %v644_v27  ;;  %v344_v20 = vpop.f32.mrf.mxu2 }
  0xc5   :  { %898 = vmatmul.f32.gmra.mxu2 %v387_v25  ;;  %921 = vmatmul.f32.gmra.mxu3 %v388_v12  ;;  %v358_v21 = vpop.f32.mrf.mxu3  ;;  %v345_v24 = vadd.f32 %v344_v20, %v1691_v63 }
  0xc6   :  { %933 = vmatpush.msrb.mxu0 %v592_v28  ;;  %956 = vmatpush.msrb.mxu1 %v608_v29  ;;  %v359_v25 = vadd.f32 %v358_v21, %v1691_v63 }
  0xc7   :  { %976 = vmatpush.msrb.mxu2 %v627_v30  ;;  %999 = vmatpush.msrb.mxu3 %v643_v31  ;;  %v391_v12 = vmax.f32 %v345_v24, 0.0 }
  0xc8   :  { %934 = vmatpush.msrb.mxu0 %v591_v32  ;;  %957 = vmatpush.msrb.mxu1 %v607_v33  ;;  %v392_v26 = vmax.f32 %v359_v25, 0.0 }
  0xc9   :  { %977 = vmatpush.msrb.mxu2 %v626_v34  ;;  %1000 = vmatpush.msrb.mxu3 %v642_v35 }
  0xca   :  { %935 = vmatpush.msrb.mxu0 %v590_v36  ;;  %958 = vmatpush.msrb.mxu1 %v606_v37 }
  0xcb   :  { %978 = vmatpush.msrb.mxu2 %v625_v38  ;;  %1001 = vmatpush.msrb.mxu3 %v641_v39 }
  0xcc   :  { %936 = vmatpush.msrb.mxu0 %v589_v40  ;;  %959 = vmatpush.msrb.mxu1 %v605_v41 }
  0xcd   :  { %979 = vmatpush.msrb.mxu2 %v624_v42  ;;  %1002 = vmatpush.msrb.mxu3 %v640_v43 }
  0xce   :  { %937 = vmatpush.msrb.mxu0 %v588_v46  ;;  %960 = vmatpush.msrb.mxu1 %v604_v47 }
  0xcf   :  { %980 = vmatpush.msrb.mxu2 %v623_v48  ;;  %1003 = vmatpush.msrb.mxu3 %v639_v49 }
  0xd0   :  { %938 = vmatpush.msrb.mxu0 %v587_v50  ;;  %961 = vmatpush.msrb.mxu1 %v603_v51 }
  0xd1   :  { %981 = vmatpush.msrb.mxu2 %v622_v53  ;;  %1004 = vmatpush.msrb.mxu3 %v638_v54 }
  0xd2   :  { %939 = vmatpush.msrb.mxu0 %v586_v55  ;;  %962 = vmatpush.msrb.mxu1 %v602_v56 }
  0xd3   :  { %982 = vmatpush.msrb.mxu2 %v621_v59  ;;  %1005 = vmatpush.msrb.mxu3 %v637_v60 }
  0xd4   :  { %940 = vmatpush.msrb.mxu0 %v585_v0  ;;  %963 = vmatpush.msrb.mxu1 %v601_v1 }
  0xd5   :  { %983 = vmatpush.msrb.mxu2 %v620_v2  ;;  %1006 = vmatpush.msrb.mxu3 %v636_v3 }
  0xd6   :  { %941 = vmatmul.f32.vlgmr.msrb.gmra.mxu0 %v373_v4  ;;  %964 = vmatmul.f32.vlgmr.msrb.gmra.mxu1 %v374_v5 }
  0xd7   :  { %984 = vmatpush.msrb.mxu2 %v619_v6  ;;  %1007 = vmatpush.msrb.mxu3 %v635_v7 }
  0xd9   :  { %985 = vmatpush.msrb.mxu2 %v618_v13  ;;  %1008 = vmatpush.msrb.mxu3 %v634_v14 }
  0xdb   :  { %986 = vmatpush.msrb.mxu2 %v617_v52  ;;  %1009 = vmatpush.msrb.mxu3 %v633_v17 }
  0xdc   :  { %987 = vmatmul.f32.vlgmr.msrb.gmra.mxu2 %v375_v18  ;;  %1010 = vmatmul.f32.vlgmr.msrb.gmra.mxu3 %v376_v19 }
  0xde   :  { %944 = vmatmul.f32.gmra.mxu0 %v389_v22  ;;  %967 = vmatmul.f32.gmra.mxu1 %v390_v23 }
  0xe4   :  { %990 = vmatmul.f32.gmra.mxu2 %v391_v12  ;;  %1013 = vmatmul.f32.gmra.mxu3 %v392_v26 }
 0x107   :  { %v666_v27 = vpop.f32.mrf.mxu0  ;;  %v689_v28 = vpop.f32.mrf.mxu1 }
 0x108   :  { %v690_v37 = vadd.f32 %v689_v28, %v666_v27 }
 0x111   :  { %v669_v29 = vpop.f32.mrf.mxu0  ;;  %v692_v32 = vpop.f32.mrf.mxu1 }
 0x112   :  { %v693_v42 = vadd.f32 %v692_v32, %v669_v29 }
 0x114   :  { %v712_v30 = vpop.f32.mrf.mxu2 }
 0x115   :  { %v735_v31 = vpop.f32.mrf.mxu3  ;;  %v713_v38 = vadd.f32 %v712_v30, %v690_v37 }
 0x117   :  { %v736_v41 = vadd.f32 %v735_v31, %v713_v38 }
 0x11b   :  { %v758_v33 = vpop.f32.mrf.mxu0  ;;  %v781_v36 = vpop.f32.mrf.mxu1 }
 0x11c   :  { %v759_v44 = vadd.f32 %v758_v33, %v736_v41 }
 0x11e   :  { %v715_v34 = vpop.f32.mrf.mxu2  ;;  %v738_v35 = vpop.f32.mrf.mxu3  ;;  %v782_v49 = vadd.f32 %v781_v36, %v759_v44 }
 0x11f   :  { %v716_v45 = vadd.f32 %v715_v34, %v693_v42 }
 0x121   :  { %v739_v50 = vadd.f32 %v738_v35, %v716_v45 }
 0x125   :  { %v761_v39 = vpop.f32.mrf.mxu0  ;;  %v784_v43 = vpop.f32.mrf.mxu1 }
 0x126   :  { %v762_v53 = vadd.f32 %v761_v39, %v739_v50 }
 0x128   :  { %v804_v63 = vpop.f32.mrf.mxu2  ;;  %v827_v40 = vpop.f32.mrf.mxu3  ;;  %v785_v56 = vadd.f32 %v784_v43, %v762_v53 }
 0x129   :  { %v805_v51 = vadd.f32 %v804_v63, %v782_v49 }
 0x12b   :  { %v828_v55 = vadd.f32 %v827_v40, %v805_v51 }
 0x130   :  { %v850_v46 = vpop.f32.mrf.mxu0  ;;  %v873_v54 = vpop.f32.mrf.mxu1 }
 0x131   :  { %v851_v60 = vadd.f32 %v850_v46, %v828_v55 }
 0x132   :  { %v807_v47 = vpop.f32.mrf.mxu2  ;;  %v830_v48 = vpop.f32.mrf.mxu3 }
 0x133   :  { %v808_v61 = vadd.f32 %v807_v47, %v785_v56  ;;  %v874_v62 = vadd.f32 %v873_v54, %v851_v60 }
 0x135   :  { %v831_v0 = vadd.f32 %v830_v48, %v808_v61 }
 0x13b   :  { %v853_v57 = vpop.f32.mrf.mxu0  ;;  %v876_v1 = vpop.f32.mrf.mxu1 }
 0x13c   :  { %v854_v4 = vadd.f32 %v853_v57, %v831_v0 }
 0x13e   :  { %v896_v58 = vpop.f32.mrf.mxu2  ;;  %v919_v59 = vpop.f32.mrf.mxu3  ;;  %v877_v8 = vadd.f32 %v876_v1, %v854_v4 }
 0x13f   :  { %v897_v2 = vadd.f32 %v896_v58, %v874_v62 }
 0x141   :  { %v920_v7 = vadd.f32 %v919_v59, %v897_v2 }
 0x148   :  { %v899_v5 = vpop.f32.mrf.mxu2  ;;  %v922_v6 = vpop.f32.mrf.mxu3 }
 0x149   :  { %v900_v11 = vadd.f32 %v899_v5, %v877_v8 }
 0x14b   :  { %v923_v52 = vadd.f32 %v922_v6, %v900_v11 }
 0x153   :  { %v942_v3 = vpop.f32.mrf.mxu0  ;;  %v965_v10 = vpop.f32.mrf.mxu1 }
 0x154   :  { %v943_v9 = vadd.f32 %v942_v3, %v920_v7 }
 0x156   :  { %v966_v13 = vadd.f32 %v965_v10, %v943_v9 }
 0x15b   :  { %v945_v14 = vpop.f32.mrf.mxu0  ;;  %v968_v20 = vpop.f32.mrf.mxu1 }
 0x15c   :  { %v946_v18 = vadd.f32 %v945_v14, %v923_v52 }
 0x15e   :  { %v969_v21 = vadd.f32 %v968_v20, %v946_v18 }
 0x15f   :  { %v988_v15 = vpop.f32.mrf.mxu2  ;;  %v1011_v16 = vpop.f32.mrf.mxu3 }
 0x160   :  { %v989_v17 = vadd.f32 %v988_v15, %v966_v13 }
 0x162   :  { %v1012_v19 = vadd.f32 %v1011_v16, %v989_v17 }
 0x164   :  { %1017 = vst [vmem:[%s2105_s4] sm:$0xff] %v1012_v19 }
 0x167   :  { %v991_v22 = vpop.f32.mrf.mxu2  ;;  %v1014_v24 = vpop.f32.mrf.mxu3 }
 0x168   :  { %v992_v23 = vadd.f32 %v991_v22, %v969_v21 }
 0x16a   :  { %v1015_v25 = vadd.f32 %v1014_v24, %v992_v23 }
 0x16c   :  { %1018 = vst [vmem:[%s2105_s4 + $0x8] sm:$0xff] %v1015_v25 }

</bundles_post_ra>
